<compile_context>
chip_gen: v7x
topology: tpu7x:2x2x1
jax: 0.10.0
libtpu: 0.0.40
codegen_flags: <defaults>
</compile_context>

<pallas_src>
import functools
import math

import jax
import jax.numpy as jnp
from jax.experimental import pallas as pl
from jax.experimental.pallas import tpu as pltpu


def _round_up(x, m):
    return ((x + m - 1) // m) * m


def _cdiv(a, b):
    return (a + b - 1) // b


# ---------------------------------------------------------------------------
# Kernels
# ---------------------------------------------------------------------------
def _sine_kernel_direct(x_ref, w_ref, b_ref, o_ref):
    # Single K step: z = x @ W + b in f32, then sin.  Shapes:
    # x_ref (tm, K), w_ref (K, tn), b_ref (1, tn), o_ref (tm, tn).
    z = jnp.dot(x_ref[...], w_ref[...], preferred_element_type=jnp.float32)
    z = z + b_ref[...].astype(jnp.float32)        # broadcast row over tm
    o_ref[...] = jnp.sin(z).astype(o_ref.dtype)   # omega_0 already folded in


def _sine_kernel_acc(x_ref, w_ref, b_ref, o_ref, acc_ref):
    # K-tiled path: accumulate partial products in a VMEM f32 scratch;
    # apply bias + sin only on the last K step.
    k = pl.program_id(2)

    @pl.when(k == 0)
    def _():
        acc_ref[...] = jnp.zeros_like(acc_ref)

    acc_ref[...] += jnp.dot(x_ref[...], w_ref[...],
                            preferred_element_type=jnp.float32)

    @pl.when(k == pl.num_programs(2) - 1)
    def _():
        z = acc_ref[...] + b_ref[...].astype(jnp.float32)
        o_ref[...] = jnp.sin(z).astype(o_ref.dtype)


# ---------------------------------------------------------------------------
# Parameter prep (call once, NOT per forward)
# ---------------------------------------------------------------------------
def prepare_sine_layer_params(weight, bias, *, omega_0=30.0, lane_multiple=128):
    """Transpose PyTorch [out, in] -> [in, out], fold omega_0 into W and b,
    zero-pad out_features to a multiple of `lane_multiple` for lane-dense
    stores.  For a very narrow final layer pass lane_multiple=1."""
    n_out, _k = weight.shape
    n_pad = _round_up(n_out, lane_multiple)
    w_kn = (omega_0 * weight).T                     # [K, N]
    b_row = (omega_0 * bias).reshape(1, n_out)
    if n_pad != n_out:
        w_kn = jnp.pad(w_kn, ((0, 0), (0, n_pad - n_out)))
        b_row = jnp.pad(b_row, ((0, 0), (0, n_pad - n_out)))
    return w_kn, b_row


# ---------------------------------------------------------------------------
# VMEM budget / BlockSpec helpers
# ---------------------------------------------------------------------------
def _vmem_budget_and_limit():
    """Generation-aware budget: ~62% of physical VMEM as working-set target,
    ~75% as the scoped-VMEM limit passed to Mosaic.  (v7x: 64 MiB/TC,
    v5e/v6e: 128 MiB.)"""
    try:
        phys = int(pltpu.get_tpu_info().vmem_capacity_bytes)
    except Exception:
        phys = 64 * 1024 * 1024          # conservative fallback (v7x-sized)
    return (phys * 5) // 8, (phys * 3) // 4


def _make_spec(block_shape, index_map, invariant):
    """Single-buffer grid-invariant operands (second buffer is VMEM waste)."""
    if invariant:
        try:
            return pl.BlockSpec(block_shape, index_map,
                                pipeline_mode=pl.Buffered(1))
        except (TypeError, AttributeError):
            pass                         # older jax: fall back to default
    return pl.BlockSpec(block_shape, index_map)


# ---------------------------------------------------------------------------
# Forward wrapper
# ---------------------------------------------------------------------------
def sine_layer(x, w_kn, b_row, *, out_features=None, compute_dtype=None,
               vmem_budget_bytes=None, tn_max=512, tk_max=512):
    """x: [M, K]; w_kn: [K, Np] (omega folded, padded); b_row: [1, Np].
    Returns sin(omega_0 * (x @ W^T + b)), shape [M, Np] (padded) or
    [M, out_features] if requested (prefer keeping it padded between layers)."""
    M, K = x.shape
    K_w, Np = w_kn.shape
    assert K == K_w, (K, K_w)
    out_dtype = x.dtype

    # Optional bf16 operands for the MXU; accumulation / bias / sin stay f32.
    if compute_dtype is not None:
        x_in = x.astype(compute_dtype)
        w_in = w_kn.astype(compute_dtype)
    else:
        x_in, w_in = x, w_kn

    in_isz = jnp.dtype(x_in.dtype).itemsize
    w_isz = jnp.dtype(w_in.dtype).itemsize
    out_isz = jnp.dtype(out_dtype).itemsize

    if vmem_budget_bytes is None:
        vmem_budget_bytes, vmem_limit_bytes = _vmem_budget_and_limit()
    else:
        vmem_limit_bytes = int(vmem_budget_bytes * 5) // 4

    # ---- N / K tiles ------------------------------------------------------
    tn = Np if Np <= tn_max else tn_max           # lane-dense (Np % 128 == 0)
    if K <= 2 * tk_max or (K % 128) != 0:
        tk = K                                     # single K step (common case)
    else:
        tk = tk_max
    gn = _cdiv(Np, tn)
    gk = _cdiv(K, tk)
    invariant_wb = (gn == 1 and gk == 1)           # weight/bias never change
    w_bufs = 1 if invariant_wb else 2

    # ---- M tile: grow toward the VMEM budget ------------------------------
    def footprint(tm_):
        f = (2 * tm_ * tk * in_isz                 # double-buffered x tiles
             + w_bufs * tk * tn * w_isz            # weight tile(s)
             + 2 * tn * 4                          # bias row
             + 2 * tm_ * tn * out_isz              # double-buffered out tiles
             + tm_ * tn * 4)                       # f32 matmul intermediate
        if gk > 1:
            f += tm_ * tn * 4                      # accumulator scratch
        return int(f * 1.15)                       # ~15% headroom

    cap = _round_up(M, 8)
    if M >= 16:
        # Keep >=2 M-steps so the "parallel" axis spans both v7x TensorCores.
        cap = min(cap, _round_up(_cdiv(M, 2), 8))
    candidates = [c for c in (2048, 1024, 512, 256, 128, 64, 32, 16, 8)
                  if c <= cap]
    if not candidates or candidates[0] < cap:
        candidates.insert(0, cap)
    tm = next((c for c in candidates if footprint(c) <= vmem_budget_bytes),
              candidates[-1])
    gm = _cdiv(M, tm)

    grid = (gm, gn, gk)

    x_spec = pl.BlockSpec((tm, tk), lambda i, j, k: (i, k))
    w_spec = _make_spec((tk, tn), lambda i, j, k: (k, j), invariant_wb)
    b_spec = _make_spec((1, tn), lambda i, j, k: (0, j), invariant_wb)
    o_spec = pl.BlockSpec((tm, tn), lambda i, j, k: (i, j))

    if gk == 1:
        kernel = _sine_kernel_direct
        scratch = ()
    else:
        kernel = _sine_kernel_acc
        scratch = (pltpu.VMEM((tm, tn), jnp.float32),)

    cost = pl.CostEstimate(
        flops=2 * M * K * Np,
        transcendentals=M * Np,
        bytes_accessed=(M * K * in_isz + K * Np * w_isz + Np * 4
                        + M * Np * out_isz),
    )

    out = pl.pallas_call(
        kernel,
        out_shape=jax.ShapeDtypeStruct((M, Np), out_dtype),
        grid_spec=pltpu.PrefetchScalarGridSpec(
            num_scalar_prefetch=0,
            grid=grid,
            in_specs=[x_spec, w_spec, b_spec],
            out_specs=o_spec,
            scratch_shapes=scratch,
        ),
        compiler_params=pltpu.CompilerParams(
            dimension_semantics=("parallel", "parallel", "arbitrary"),
            vmem_limit_bytes=int(vmem_limit_bytes),
        ),
        cost_estimate=cost,
    )(x_in, w_in, b_row)

    if out_features is not None and out_features != Np:
        # Extra HBM pass — prefer keeping activations padded between layers.
        out = out[:, :out_features]
    return out


# ---------------------------------------------------------------------------
# SIREN init (matches SineLayer.init_weights / nn.Linear bias default)
# ---------------------------------------------------------------------------
def init_sine_layer_params(key, in_features, out_features, *, is_first=False,
                           omega_0=30.0):
    """Returns PyTorch-layout params (weight [out, in], bias [out])."""
    wk, bk = jax.random.split(key)
    if is_first:
        bound_w = 1.0 / in_features
    else:
        bound_w = math.sqrt(6.0 / in_features) / omega_0
    weight = jax.random.uniform(wk, (out_features, in_features), jnp.float32,
                                minval=-bound_w, maxval=bound_w)
    bound_b = 1.0 / math.sqrt(in_features)
    bias = jax.random.uniform(bk, (out_features,), jnp.float32,
                              minval=-bound_b, maxval=bound_b)
    return weight, bias


if __name__ == "__main__":
    key = jax.random.PRNGKey(0)
    xk, pk = jax.random.split(key)

    in_features = 64
    out_features = 32
    omega_0 = 30.0

    weight, bias = init_sine_layer_params(
        pk, in_features, out_features, is_first=True, omega_0=omega_0)

    # Prep params ONCE (transpose + omega fold + lane padding), then run.
    w_kn, b_row = prepare_sine_layer_params(weight, bias, omega_0=omega_0)
    fwd = jax.jit(sine_layer)

    # M=16: normal case; M=19: exercises a partial (masked) last M tile.
    for M in (16, 19):
        x = jax.random.normal(jax.random.fold_in(xk, M), (M, in_features),
                              jnp.float32)
        out = fwd(x, w_kn, b_row)
        jax.block_until_ready(out)

        # Pure-JAX reference (original, unfolded formulation).
        ref = jnp.sin(omega_0 * (x @ weight.T + bias))
        assert out.shape == (M, w_kn.shape[1])
        got = out[:, :out_features]          # trim lane padding (test only)
        err = float(jnp.max(jnp.abs(got - ref)))
        assert jnp.allclose(got, ref, atol=5e-5, rtol=1e-5), err

    print("KERNEL_OK")
</pallas_src>

<mosaic_0001>
module attributes {stable_mosaic.version = 11 : i64} {
  func.func @_sine_kernel_direct(%arg0: i32, %arg1: i32, %arg2: i32, %arg3: memref<8x64xf32, #tpu.memory_space<vmem>>, %arg4: memref<64x128xf32, #tpu.memory_space<vmem>>, %arg5: memref<1x128xf32, #tpu.memory_space<vmem>>, %arg6: memref<8x128xf32, #tpu.memory_space<vmem>>) attributes {dimension_semantics = [#tpu.dimension_semantics<parallel>, #tpu.dimension_semantics<parallel>, #tpu.dimension_semantics<arbitrary>], iteration_bounds = array<i64: 2, 1, 1>, scalar_prefetch = 0 : i64, scratch_operands = 0 : i64, tpu.core_type = #tpu.core_type<tc>, window_params = [{transform_indices = @transform_0, window_bounds = array<i64: 8, 64>}, {pipeline_mode = #tpu.pipeline_mode<synchronous>, transform_indices = @transform_1, window_bounds = array<i64: 64, 128>}, {pipeline_mode = #tpu.pipeline_mode<synchronous>, transform_indices = @transform_2, window_bounds = array<i64: 1, 128>}, {transform_indices = @transform_3, window_bounds = array<i64: 8, 128>}]} {
    %c0 = arith.constant 0 : index
    %c0_0 = arith.constant 0 : index
    %0 = vector.load %arg3[%c0, %c0_0] : memref<8x64xf32, #tpu.memory_space<vmem>>, vector<8x64xf32>
    %c0_1 = arith.constant 0 : index
    %c0_2 = arith.constant 0 : index
    %1 = vector.load %arg4[%c0_1, %c0_2] : memref<64x128xf32, #tpu.memory_space<vmem>>, vector<64x128xf32>
    %cst = arith.constant dense<0.000000e+00> : vector<8x128xf32>
    %2 = tpu.matmul %0, %1, %cst {dimension_numbers = #tpu.dot_dimension_numbers<[1], [0], [0], [1], [0, 0, 1, 1], [], []>} : vector<8x64xf32>, vector<64x128xf32>, vector<8x128xf32> -> vector<8x128xf32>
    %c0_3 = arith.constant 0 : index
    %c0_4 = arith.constant 0 : index
    %3 = vector.load %arg5[%c0_3, %c0_4] : memref<1x128xf32, #tpu.memory_space<vmem>>, vector<1x128xf32>
    %4 = vector.broadcast %3 : vector<1x128xf32> to vector<8x128xf32>
    %5 = arith.addf %2, %4 : vector<8x128xf32>
    %6 = math.sin %5 : vector<8x128xf32>
    %c0_5 = arith.constant 0 : index
    %c0_6 = arith.constant 0 : index
    %7 = vector.load %arg6[%c0_5, %c0_6] : memref<8x128xf32, #tpu.memory_space<vmem>>, vector<8x128xf32>
    tpu.vector_store %arg6[%c0_5, %c0_6], %6 {strides = array<i32>} : memref<8x128xf32, #tpu.memory_space<vmem>>, vector<8x128xf32>,
    return
  }
  func.func @transform_0(%arg0: i32, %arg1: i32, %arg2: i32) -> (i32, i32) {
    %c0_i32 = arith.constant 0 : i32
    return %arg0, %arg2 : i32, i32
  }
  func.func @transform_1(%arg0: i32, %arg1: i32, %arg2: i32) -> (i32, i32) {
    %c0_i32 = arith.constant 0 : i32
    return %arg2, %arg1 : i32, i32
  }
  func.func @transform_2(%arg0: i32, %arg1: i32, %arg2: i32) -> (i32, i32) {
    %c0_i32 = arith.constant 0 : i32
    %c0_i32_0 = arith.constant 0 : i32
    return %c0_i32, %arg1 : i32, i32
  }
  func.func @transform_3(%arg0: i32, %arg1: i32, %arg2: i32) -> (i32, i32) {
    %c0_i32 = arith.constant 0 : i32
    return %arg0, %arg1 : i32, i32
  }
}

</mosaic_0001>

<bundles_post_ra>
// kernel: sine_layer.1
= control target key start
LH: loop header
LB: loop body
LE: loop exit
PB: predicated region body
PF: predicated region fallthrough
CT: control target
= control target key end

     0   :  { %8 = vsyncpa [#allocation3], 0  ;;  %s1146_s0 = inlined_call_operand.hbm [shape: f32[16,64], index: 0, kind: input, shape index: {}]   ;;  %s1147_s1 = inlined_call_operand.hbm [shape: f32[64,128], index: 1, kind: input, shape index: {}]   ;;  %s1148_s2 = inlined_call_operand.vmem [shape: f32[1,128], index: 2, kind: input, shape index: {}]   ;;  %s1149_s3 = inlined_call_operand.hbm [shape: f32[16,128], index: 3, kind: output, shape index: {}]  }
   0x1   :  { %10 = vsyncpa [#allocation3 + $0x1], 0 }
   0x2   :  { %11 = vsyncpa [#allocation6], 0 }
   0x3   :  { %12 = vsyncpa [#allocation4], 0 }
   0x4   :  { %14 = vsyncpa [#allocation4 + $0x1], 0  ;;  %s904_s12 = smov 0   ;;  %s906_s13 = smov 0  }
   0x5   :  { %s908_s14 = smov 0   ;;  %s910_s15 = smov 0  }
   0x6   :  { %s912_s16 = smov 0   ;;  %s914_s17 = smov 0  }
   0x7 LB: > { %s570_s18 = sadd.s32 4294967295, %s868_s17   ;;  %s571_s19 = sadd.s32 4294967294, %s868_s17   ;;  %s868_s17 = sphi %s914_s17, %s20_s17   ;;  %s864_s16 = sphi %s912_s16, %s1173_s16   ;;  %s860_s15 = sphi %s910_s15, %s1172_s15   ;;  %s856_s14 = sphi %s908_s14, %s1171_s14   ;;  %s852_s13 = sphi %s906_s13, %s1170_s13   ;;  %s848_s12 = sphi %s904_s12, %s1169_s12  }
   0x8   : > { %p61_p0 = scmp.ne.s32.totalorder %s852_s13, %s848_s12  ;;  %p938_p1 = scmp.eq.s32.totalorder %s570_s18, 0 }
   0x9   : > { %p942_p2 = scmp.eq.s32.totalorder %s570_s18, 1  ;;  %p147_p3 = scmp.eq.s32.totalorder %s571_s19, 1 }
   0xa   : > { %s1154_s20 = scalar_select %p938_p1, 1, 0 }
   0xb   : > { %s1155_s21 = scalar_select %p942_p2, 1, 0 }
   0xc   : > { %p948_p4 = por %p938_p1, %p61_p0  ;;  %p572_p5 = scmp.ge.s32.totalorder %s868_s17, 1 }
   0xd   : > { %p953_p6 = por %p147_p3, %p61_p0  ;;  %p154_p7 = scmp.lt.s32.totalorder %s868_s17, 3 }
   0xe   : > { %s1156_s22 = scalar_select %p948_p4, 1, 0 }
   0xf   : > { %s1157_s23 = scalar_select %p953_p6, 1, 0 }
  0x10   : > { %p958_p8 = pnand %p572_p5, %p154_p7  ;;  %s870_s25 = smov [#allocation5]  }
  0x11   : > { %s170_s26 = sshll.u32 %s870_s25, 4  ;;  %s39_s28 = sadd.s32 1, %s864_s16  ;;  %s171_s26 = int_to_ptr.vmem [resolvable:$true] %s170_s26 }
  0x12   : > { %s1158_s24 = scalar_select %p958_p8, 1, 0 }
  0x13   : > { %p644_p9 = pneg %p958_p8  ;;  %s724_s4 = scalar_lea.hbm %s1147_s1, 1024 }
  0x14   : > { %p725_p12 = scmp.ne.s32.totalorder %s1147_s1, %s724_s4  ;;  %p731_p5 = scmp.lt.u32.totalorder %s724_s4, %s1147_s1 }
  0x15   : > { %p967_p11 = pnand %p644_p9, %p938_p1 }
  0x17   : > { %p726_p13 = pneg %p967_p11 }
  0x19   : > { %p727_p0 = pnand %p726_p13, %p725_p12 }
  0x1b   : > { %p728_p3 = pneg %p727_p0 }
  0x1d   : > { %p733_p7 = pnand %p731_p5, %p728_p3 }
  0x1f   : > { %736 = shalt.err (!%p733_p7)
}
  0x20   : > { %s737_s9 = scalar_lea.vmem %s171_s26, 1024  ;;  %p745_p1 = scmp.lt.s32.totalorder %s171_s26, %s171_s26 }
  0x21   : > { %p738_p9 = scmp.ne.s32.totalorder %s171_s26, %s737_s9  ;;  %p746_p4 = scmp.lt.s32.totalorder %s737_s9, %s737_s9 }
  0x23   : > { %p740_p10 = pnand %p738_p9, %p726_p13  ;;  %p747_p8 = por %p746_p4, %p745_p1 }
  0x25   : > { %p741_p6 = pneg %p740_p10 }
  0x27   : > { %p748_p2 = pnand %p747_p8, %p741_p6 }
  0x29   : > { %751 = shalt.err (!%p748_p2)
}
  0x2a   : > { %s871_s10 = smov 128   ;;  %s872_s11 = smov 8  }
  0x2b   : > { %647 = dma.hbm_to_vmem [thread:$0]  (!%p967_p11), %s1147_s1, 1024, %s171_s26, [#allocation6], %s871_s10, %s871_s10, %s872_s11  }
  0x2c   : > { %p41_p1 = scmp.ge.s32.totalorder %s39_s28, 2  ;;  %s48_s25 = sadd.s32 1, %s856_s14 }
  0x2d   : > { %p55_p2 = scmp.ne.s32.totalorder %s856_s14, %s852_s13  ;;  %p56_p4 = scmp.eq.s32.totalorder %s868_s17, 0 }
  0x2e   : > { %s1175_s28 = smov (%p41_p1, %s39_s28), 0  ;;  %p1161_p8 = scmp.ne.s32.totalorder %s1155_s21, 0 }
  0x2f   : > { %p994_p6 = por %p56_p4, %p55_p2  ;;  %s43_s27 = ssub.s32 %s864_s16, %s1175_s28 }
  0x30   : > { %p1000_p10 = por %p1161_p8, %p55_p2  ;;  %p657_p12 = scmp.lt.s32.totalorder %s868_s17, 2 }
  0x31   : > { %p46_p11 = scmp.eq.s32.totalorder %s43_s27, 0  ;;  %s190_s26 = sand.u32 1, %s856_s14  }
  0x32   : > { %s576_s4 = sshll.u32 %s190_s26, 3  ;;  %s577_s6 = sshll.u32 %s864_s16, 7 }
  0x33   : > { %s1009_s5 = scalar_select %p46_p11, %s856_s14, %s48_s25  }
  0x34   : > { %s1015_s9 = scalar_lea.hbm %s1146_s0, %s577_s6  ;;  %s194_s21 = scalar_lea.vmem [#allocation2], %s576_s4 }
  0x35   : > { %s202_s10 = sshll.u32 %s194_s21, 4  ;;  %p1021_p13 = pnand %p657_p12, %p994_p6  ;;  %s1017_s10 = int_to_ptr.vmem [resolvable:$true] %s202_s10 }
  0x36   : > { %s191_s18 = scalar_lea.sflag [#allocation3], %s190_s26  ;;  %s752_s19 = scalar_lea.hbm %s1015_s9, 128 }
  0x37   : > { %p753_p0 = scmp.ne.s32.totalorder %s1015_s9, %s752_s19  ;;  %p754_p3 = pneg %p1021_p13 }
  0x38   : > { %s757_s4 = scalar_lea.hbm %s1146_s0, 256  ;;  %p758_p9 = scmp.lt.u32.totalorder %s1015_s9, %s1146_s0 }
  0x39   : > { %p755_p5 = pnand %p754_p3, %p753_p0  ;;  %p759_p1 = scmp.lt.u32.totalorder %s757_s4, %s752_s19 }
  0x3a   : > { %p761_p4 = scmp.lt.u32.totalorder %s752_s19, %s1015_s9 }
  0x3b   : > { %p756_p7 = pneg %p755_p5  ;;  %p760_p2 = por %p759_p1, %p758_p9 }
  0x3d   : > { %p762_p6 = por %p761_p4, %p760_p2 }
  0x3f   : > { %p763_p8 = pnand %p762_p6, %p756_p7 }
  0x41   : > { %766 = shalt.err (!%p763_p8)
}
  0x42   : > { %s767_s26 = scalar_lea.vmem %s1017_s10, 128  ;;  %s873_s7 = smov [#allocation2]  }
  0x43   : > { %p768_p12 = scmp.ne.s32.totalorder %s1017_s10, %s767_s26  ;;  %s772_s8 = sshll.u32 %s873_s7, 4  ;;  %s773_s8 = int_to_ptr.vmem [resolvable:$false] %s772_s8 }
  0x44   : > { %s774_s21 = scalar_lea.vmem %s773_s8, 256  ;;  %p775_p5 = scmp.lt.s32.totalorder %s1017_s10, %s773_s8 }
  0x45   : > { %p770_p11 = pnand %p768_p12, %p754_p3  ;;  %p776_p9 = scmp.lt.s32.totalorder %s774_s21, %s767_s26 }
  0x47   : > { %p771_p0 = pneg %p770_p11  ;;  %p777_p1 = por %p776_p9, %p775_p5 }
  0x49   : > { %p778_p2 = pnand %p777_p1, %p771_p0 }
  0x4b   : > { %781 = shalt.err (!%p778_p2)
}
  0x4c   : > { %651 = dma.hbm_to_vmem [thread:$0]  (!%p1021_p13), %s1015_s9, 128, %s1017_s10, %s191_s18  }
  0x4d   : > { %p1164_p7 = scmp.ne.s32.totalorder %s1158_s24, 0 }
  0x4e   : > { %s1053_s19 = sand.u32 (!%p1164_p7), 1, %s852_s13   ;;  %p1165_p3 = scmp.ne.s32.totalorder (!%p1164_p7), %s1156_s22, 0 }
  0x4f   : > { %211 = sbr.rel (%p1164_p7) target bundleno = 416 (0x1a0), region = 32  ;;  %s579_s25 = sshll.u32 (!%p1164_p7), %s1053_s19, 3 }
  0x50   : > { %s214_s27 = scalar_lea.sflag (!%p1164_p7), [#allocation3], %s1053_s19  ;;  %s217_s4 = scalar_lea.vmem (!%p1164_p7), [#allocation2], %s579_s25 }
  0x56   : > { %835 = dma.done.wait (%p1165_p3), %s214_s27, 128  }
  0x57   : > { %837 = vsyncadd (%p1165_p3), %s214_s27, 4294967168  ;;  %p1166_p13 = scmp.ne.s32.totalorder %s1154_s20, 0 }
  0x59   : > { %839 = dma.done.wait (%p1166_p13), [#allocation6], 1024  }
  0x5a   : > { %841 = vsyncadd (%p1166_p13), [#allocation6], 4294966272  ;;  %v874_v0 = vmov 0.0|0.0   ;;  %vm875_vm0 = vmmov 0   ;;  %v876_v1 = vmov 0.0   ;;  %v252_v2 = vld [vmem:[#allocation5] sm:$0xff] }
  0x5b   : > { %620 = vmatprep.subr.bf16.mxu0 %v874_v0  ;;  %617 = vmatprep.mubr.msk.f32.mxu0 %vm875_vm0, %v876_v1  ;;  %v253_v3 = vld [vmem:[#allocation5 + $0x8] sm:$0xff]  ;;  %v254_v4 = vld [vmem:[#allocation5 + $0x10] sm:$0xff]  ;;  %v255_v6 = vld [vmem:[#allocation5 + $0x18] sm:$0xff]  ;;  %vm267_vm1 = vcmask 523264   ;;  %v877_v29 = vmov 683565275  }
  0x5c   : > { %v621_v5 = vpack.c.bf16 %v253_v3, %v252_v2  ;;  %v624_v7 = vpack.c.bf16 %v255_v6, %v254_v4  ;;  %v256_v8 = vld [vmem:[#allocation5 + $0x20] sm:$0xff]  ;;  %v257_v9 = vld [vmem:[#allocation5 + $0x28] sm:$0xff]  ;;  %v258_v11 = vld [vmem:[#allocation5 + $0x30] sm:$0xff]  ;;  %v878_v31 = vmov 2475754826   ;;  %s589_s24 = sshll.u32 %s860_s15, 7 }
  0x5d   : > { %v627_v10 = vpack.c.bf16 %v257_v9, %v256_v8  ;;  %v259_v12 = vld [vmem:[#allocation5 + $0x38] sm:$0xff]  ;;  %v582_v15 = vld [vmem:[%s1148_s2] ss:$0 sm:$0xff]  ;;  %v879_v34 = vmov 2131351028   ;;  %s246_s9 = scalar_lea.vmem [#allocation7], %s579_s25  ;;  %s1097_s29 = scalar_lea.hbm %s1149_s3, %s589_s24 }
  0x5e   : > { %622 = vmatpush3.bf16.msra.mxu0 %v621_v5  ;;  %v630_v13 = vpack.c.bf16 %v259_v12, %v258_v11  ;;  %v251_v14 = vld [vmem:[%s217_s4] sm:$0xff]  ;;  %v880_v37 = vmov 2102212464   ;;  %v881_v40 = vmov 920167782   ;;  %s461_s10 = sshll.u32 %s246_s9, 4  ;;  %s1099_s10 = int_to_ptr.vmem [resolvable:$true] %s461_s10 }
  0x5f   : > { %623 = vmatprep.subr.bf16.mxu0 %v874_v0  ;;  %v882_v43 = vmov 1326507024   ;;  %s447_s15 = scalar_lea.sflag [#allocation4], %s1053_s19  ;;  %s782_s6 = scalar_lea.vmem %s1099_s10, 128 }
  0x60   : > { %p783_p4 = scmp.ne.s32.totalorder %s1099_s10, %s782_s6  ;;  %s883_s26 = smov [#allocation7]  }
  0x61   : > { %s786_s7 = sshll.u32 %s883_s26, 4  ;;  %s787_s7 = int_to_ptr.vmem [resolvable:$false] %s786_s7 }
  0x62   : > { %625 = vmatpush3.bf16.msra.mxu0 %v624_v7  ;;  %p784_p6 = pnand %p783_p4, %p1000_p10  ;;  %s788_s8 = scalar_lea.vmem %s787_s7, 256 }
  0x63   : > { %626 = vmatprep.subr.bf16.mxu0 %v874_v0  ;;  %p789_p12 = scmp.lt.s32.totalorder %s1099_s10, %s787_s7  ;;  %p790_p11 = scmp.lt.s32.totalorder %s788_s8, %s782_s6 }
  0x64   : > { %p785_p8 = pneg %p784_p6 }
  0x65   : > { %p791_p0 = por %p790_p11, %p789_p12 }
  0x66   : > { %628 = vmatpush3.bf16.msra.mxu0 %v627_v10 }
  0x67   : > { %629 = vmatprep.subr.bf16.mxu0 %v874_v0  ;;  %p792_p5 = pnand %p791_p0, %p785_p8 }
  0x6a   : > { %631 = vmatpush3.bf16.msra.mxu0 %v630_v13 }
  0x6d   : > { %618 = vmatmul.mubr.msk.f32.vlgmr.msra.gmra.mrb[0].mxu0 %vm267_vm1, %v251_v14 }
 0x140   : > { %v337_v16 = vpop.f32.mrb[0].mxu0 }
 0x141   : > { %v1070_v17 = vadd.f32 %v582_v15, %v337_v16  ;;  %v619_v18 = vpop.f32.mrb[1].mxu0 }
 0x143   : > { %v344_v19 = vand.u32 2139095040, %v1070_v17  ;;  %v341_v23 = vand.u32 2147483647, %v1070_v17  ;;  %vm343_vm9 = vcmp.lt.s32.totalorder %v1070_v17, 0  ;;  %vm433_vm14 = vweird.f32 %v1070_v17 }
 0x145   : > { %v345_v20 = vshrl.u32 %v344_v19, 23  ;;  %v348_v26 = vand.u32 8388607, %v341_v23  ;;  %vm342_vm10 = vcmp.le.f32.partialorder %v341_v23, 0.7853982 }
 0x147   : > { %v584_v21 = vadd.s32 4294967169, %v345_v20  ;;  %v349_v45 = vor.u32 8388608, %v348_v26 }
 0x149   : > { %v351_v22 = vadd.s32 1, %v584_v21  ;;  %v389_v59 = vshll.u32 %v349_v45, 8 }
 0x14b   : > { %vm352_vm2 = vcmp.gt.s32.totalorder %v351_v22, 0 }
 0x14c   : > { %v353_v24 = vsel %vm352_vm2, %v351_v22, 0 }
 0x14d   : > { %v355_v25 = vand.u32 31, %v353_v24  ;;  %v354_v28 = vshrl.u32 %v353_v24, 5 }
 0x14f   : > { %v356_v27 = vsub.s32 32, %v355_v25  ;;  %v358_v30 = vshll.u32 %v877_v29, %v355_v25  ;;  %v361_v32 = vshll.u32 %v878_v31, %v355_v25  ;;  %v364_v36 = vshll.u32 %v879_v34, %v355_v25 }
 0x150   : > { %v367_v39 = vshll.u32 %v880_v37, %v355_v25  ;;  %v370_v42 = vshll.u32 %v881_v40, %v355_v25  ;;  %vm373_vm3 = vcmp.lt.s32.totalorder %v354_v28, 1  ;;  %vm376_vm4 = vcmp.lt.s32.totalorder %v354_v28, 4 }
 0x151   : > { %v359_v33 = vshrl.u32 %v878_v31, %v356_v27  ;;  %v362_v35 = vshrl.u32 %v879_v34, %v356_v27  ;;  %v365_v38 = vshrl.u32 %v880_v37, %v356_v27  ;;  %v368_v41 = vshrl.u32 %v881_v40, %v356_v27 }
 0x152   : > { %v371_v44 = vshrl.u32 %v882_v43, %v356_v27  ;;  %v357_v54 = vshrl.u32 %v877_v29, %v356_v27  ;;  %vm375_vm5 = vcmp.lt.s32.totalorder %v354_v28, 3  ;;  %vm374_vm6 = vcmp.lt.s32.totalorder %v354_v28, 2 }
 0x153   : > { %v360_v46 = vor.u32 %v359_v33, %v358_v30  ;;  %v363_v47 = vor.u32 %v362_v35, %v361_v32  ;;  %v366_v48 = vor.u32 %v365_v38, %v364_v36  ;;  %v369_v49 = vor.u32 %v368_v41, %v367_v39 }
 0x154   : > { %v372_v50 = vor.u32 %v371_v44, %v370_v42 }
 0x155   : > { %v378_v51 = vsel %vm376_vm4, %v366_v48, 2102212464  ;;  %v381_v52 = vsel %vm373_vm3, %v360_v46, %v363_v47  ;;  %v385_v53 = vsel %vm373_vm3, %v363_v47, %v366_v48  ;;  %v382_v55 = vsel %vm376_vm4, %v369_v49, 920167782 }
 0x156   : > { %v386_v56 = vsel %vm376_vm4, %v372_v50, 1326507024  ;;  %v383_v57 = vsel %vm375_vm5, %v366_v48, %v382_v55  ;;  %v377_v60 = vsel %vm373_vm3, %v357_v54, %v360_v46  ;;  %v379_v61 = vsel %vm375_vm5, %v363_v47, %v378_v51 }
 0x157   : > { %v387_v58 = vsel %vm375_vm5, %v369_v49, %v386_v56  ;;  %v384_v62 = vsel %vm374_vm6, %v381_v52, %v383_v57  ;;  %v380_v4 = vsel %vm374_vm6, %v377_v60, %v379_v61 }
 0x158   : > { %v388_v63 = vsel %vm374_vm6, %v385_v53, %v387_v58  ;;  %v1079_v2 = vmul.u32.u64.low %v389_v59, %v384_v62  ;;  %v1080_v3 = vmul.u32.u64.high %v389_v59, %v384_v62, %v1079_v2  ;;  %v396_v6 = vmul.u32 %v389_v59, %v380_v4 }
 0x159   : > { %v1076_v0 = vmul.u32.u64.low %v389_v59, %v388_v63  ;;  %v1077_v1 = vmul.u32.u64.high %v389_v59, %v388_v63, %v1076_v0 }
 0x15a   : > { %v399_v5 = vadd.s32 1, %v1080_v3 }
 0x15b   : > { %vm398_vm7 = vc.u32 %v1077_v1, %v1079_v2  ;;  %v397_v19 = vadd.s32 %v1079_v2, %v1077_v1 }
 0x15c   : > { %v400_v7 = vsel %vm398_vm7, %v399_v5, %v1080_v3 }
 0x15d   : > { %v401_v8 = vadd.s32 %v400_v7, %v396_v6 }
 0x15f   : > { %v402_v9 = vadd.s32 536870912, %v401_v8 }
 0x161   : > { %v403_v10 = vshrl.u32 %v402_v9, 30 }
 0x163   : > { %v404_v11 = vshll.u32 %v403_v10, 30  ;;  %v427_v32 = vsub.s32 4, %v403_v10 }
 0x165   : > { %v405_v12 = vsub.s32 %v401_v8, %v404_v11  ;;  %v428_v35 = vsel %vm343_vm9, %v427_v32, %v403_v10 }
 0x166   : > { %v430_v37 = vsel %vm342_vm10, 0, %v428_v35 }
 0x167   : > { %v407_v13 = vsub.s32 0, %v405_v12  ;;  %v434_v38 = vadd.s32 3, %v430_v37 }
 0x169   : > { %v585_v14 = vmin.u32 %v407_v13, %v405_v12  ;;  %v435_v39 = vand.u32 3, %v434_v38 }
 0x16b   : > { %v409_v15 = vclz %v585_v14  ;;  %vm440_vm11 = vcmp.eq.s32.totalorder %v435_v39, 2  ;;  %vm437_vm12 = vcmp.eq.s32.totalorder %v435_v39, 0  ;;  %vm436_vm13 = vcmp.lt.s32.totalorder %v435_v39, 2 }
 0x16d   : > { %v586_v16 = vadd.s32 4294967294, %v409_v15 }
 0x16f   : > { %vm587_vm8 = vcmp.lt.s32.totalorder %v586_v16, 0 }
 0x170   : > { %v412_v18 = vsel %vm587_vm8, 0, %v586_v16 }
 0x171   : > { %v413_v20 = vsub.s32 32, %v412_v18  ;;  %v417_v21 = vsub.s32 4294967266, %v412_v18  ;;  %v414_v22 = vshll.u32 %v405_v12, %v412_v18 }
 0x173   : > { %v415_v24 = vshrl.u32 %v397_v19, %v413_v20  ;;  %v418_v25 = vadd.s32 127, %v417_v21 }
 0x175   : > { %v416_v26 = vor.u32 %v415_v24, %v414_v22  ;;  %v419_v27 = vshll.u32 %v418_v25, 23 }
 0x177   : > { %v420_v28 = vor.u32 4788187, %v419_v27  ;;  %v423_v30 = vcvt.s32.f32 %v416_v26 }
 0x179   : > { %v421_v29 = vand.u32 2147483647, %v420_v28 }
 0x17b   : > { %v424_v31 = vmul.f32 %v423_v30, %v421_v29 }
 0x17d   : > { %v425_v33 = vxor.u32 2147483648, %v424_v31 }
 0x17f   : > { %v426_v34 = vsel %vm343_vm9, %v425_v33, %v424_v31 }
 0x180   : > { %v429_v36 = vsel %vm342_vm10, %v1070_v17, %v426_v34 }
 0x181   : > { %720 = vcosq.f32 %v429_v36 }
 0x182   : > { %722 = vsinq.f32 %v429_v36 }
 0x18b   : > { %v721_v40 = vpop.eup %720 }
 0x18c   : > { %v723_v41 = vpop.eup %722  ;;  %v441_v42 = vxor.u32 2147483648, %v721_v40 }
 0x18d   : > { %v438_v43 = vxor.u32 2147483648, %v723_v41 }
 0x18e   : > { %v442_v23 = vsel %vm440_vm11, %v441_v42, %v723_v41 }
 0x18f   : > { %v439_v44 = vsel %vm437_vm12, %v721_v40, %v438_v43 }
 0x190   : > { %v443_v45 = vsel %vm436_vm13, %v439_v44, %v442_v23 }
 0x191   : > { %v444_v46 = vsel %vm433_vm14, nan, %v443_v45 }
 0x192   : > { %445 = vst [vmem:[%s246_s9] sm:$0xff] %v444_v46 }
 0x193   : > { %795 = shalt.err (!%p792_p5)
}
 0x194   : > { %s796_s21 = scalar_lea.hbm %s1097_s29, 128  ;;  %s800_s27 = scalar_lea.hbm %s1149_s3, 256 }
 0x195   : > { %p797_p9 = scmp.ne.s32.totalorder %s1097_s29, %s796_s21  ;;  %p801_p7 = scmp.lt.u32.totalorder %s1097_s29, %s1149_s3 }
 0x196   : > { %p802_p3 = scmp.lt.u32.totalorder %s800_s27, %s796_s21  ;;  %p804_p4 = scmp.lt.u32.totalorder %s796_s21, %s1097_s29 }
 0x197   : > { %p798_p1 = pnand %p797_p9, %p1000_p10 }
 0x198   : > { %p803_p13 = por %p802_p3, %p801_p7 }
 0x199   : > { %p799_p2 = pneg %p798_p1 }
 0x19a   : > { %p805_p6 = por %p804_p4, %p803_p13 }
 0x19c   : > { %p806_p8 = pnand %p805_p6, %p799_p2 }
 0x19e   : > { %809 = shalt.err (!%p806_p8)
}
 0x19f   : > { %642 = dma.vmem_to_hbm [thread:$0]  (%p1000_p10), %s1099_s10, 128, %s1097_s29, %s447_s15  }
 0x1a0 PF: > { %s473_s22 = sand.u32 1, %s848_s12   ;;  %p1167_p12 = scmp.ne.s32.totalorder %s1157_s23, 0 }
 0x1a1   : > { %p1168_p11 = scmp.ge.s32.totalorder %s868_s17, 2  ;;  %s474_s24 = scalar_lea.sflag [#allocation4], %s473_s22 }
 0x1a3   : > { %p653_p0 = pnand %p1168_p11, %p1167_p12 }
 0x1a5   : > { %843 = dma.done.wait (!%p653_p0), %s474_s24, 128  }
 0x1a6   : > { %845 = vsyncadd (!%p653_p0), %s474_s24, 4294967168  ;;  %s20_s17 = sadd.s32 1, %s868_s17   ;;  %s1169_s12 = smov %s852_s13 }
 0x1a7   : > { %p17_p5 = scmp.ge.s32.totalorder %s20_s17, 4   ;;  %s1170_s13 = smov %s856_s14 }
 0x1a8   : > { %s1171_s14 = smov %s1009_s5  ;;  %s1172_s15 = smov %s864_s16 }
 0x1a9   : > { %s1173_s16 = smov %s1175_s28  ;;  %19 = sbr.rel (!%p17_p5) target bundleno = 7 (0x7), region = 85 }
 0x1b0   :  { %479 = vsyncpa [#allocation3], 1 }
 0x1b1   :  { %481 = vsyncpa [#allocation3 + $0x1], 1 }
 0x1b2   :  { %482 = vsyncpa [#allocation6], 1 }
 0x1b3   :  { %483 = vsyncpa [#allocation4], 1 }
 0x1b4   :  { %485 = vsyncpa [#allocation4 + $0x1], 1 }

</bundles_post_ra>
